<compile_context>
chip_gen: v7x
topology: tpu7x:2x2x1
jax: 0.10.0
libtpu: 0.0.40
codegen_flags: <defaults>
</compile_context>

<pallas_src>
import jax
import jax.numpy as jnp
from jax.experimental import pallas as pl
from jax.experimental.pallas import tpu as pltpu

HIDDEN = 64           # fc1/fc2 width from the PyTorch module
ROW_ALIGN = 16        # lcm of f32 (8-row) and bf16 (16-row) sublane tiles
MAX_SINGLE_TILE = 1024  # up to this many rows -> one grid step
TARGET_TILE = 512     # multi-tile target rows/tile (85%+ of HBM roofline)


def _round_up(n, m):
    return ((n + m - 1) // m) * m


def _cdiv(a, b):
    return -(-a // b)


def _mlp_kernel(x_ref, w1_ref, b1_ref, w2_ref, b2_ref, w3_ref, b3_ref, o_ref):
    # One (TM, S) batch tile runs the whole fused fc1->relu->fc2->relu->fc3
    # chain; all matmuls hit the MXU with f32 accumulation.  Activations are
    # cast back to the weight dtype between layers so the bf16 path stays bf16
    # on the MXU inputs (no-op for the default f32 path).
    x = x_ref[...]
    h1 = jnp.dot(x, w1_ref[...], preferred_element_type=jnp.float32) + b1_ref[...]
    h1 = jnp.maximum(h1, 0.0)
    h2 = jnp.dot(h1.astype(w2_ref.dtype), w2_ref[...],
                 preferred_element_type=jnp.float32) + b2_ref[...]
    h2 = jnp.maximum(h2, 0.0)
    out = jnp.dot(h2.astype(w3_ref.dtype), w3_ref[...],
                  preferred_element_type=jnp.float32) + b3_ref[...]
    o_ref[...] = out.astype(o_ref.dtype)


def _choose_tiling(batch):
    """Return (padded_batch, tile_rows).

    <= MAX_SINGLE_TILE rows: single grid step, pad only to ROW_ALIGN.
    Larger: ~TARGET_TILE-row tiles, even tile count (v7x dual-TC balance),
    at most a fraction of one tile of padding.
    """
    pad_b = _round_up(max(batch, ROW_ALIGN), ROW_ALIGN)
    if pad_b <= MAX_SINGLE_TILE:
        return pad_b, pad_b
    n_tiles = _cdiv(pad_b, TARGET_TILE)
    if n_tiles % 2:
        n_tiles += 1                      # even grid -> both v7x TensorCores busy
    tm = _round_up(_cdiv(pad_b, n_tiles), ROW_ALIGN)
    return tm * n_tiles, tm


def network_forward(x, params):
    """Fused Pallas forward pass for the 3-layer Q-network.

    x:      [B, state_size] float32
    params: dict with w1 [S,64], b1 [1,64], w2 [64,64], b2 [1,64],
            w3 [64,action_size], b3 [1,action_size]
            (weights may be bf16 via prepare_params; biases stay f32)
    returns [B, action_size] float32
    """
    B, S = x.shape
    A = params["w3"].shape[1]
    compute_dtype = params["w1"].dtype

    pad_b, tm = _choose_tiling(B)
    if x.dtype != compute_dtype:
        x = x.astype(compute_dtype)
    if pad_b != B:
        x = jnp.pad(x, ((0, pad_b - B), (0, 0)))   # zero rows: inert, sliced off
    grid = (pad_b // tm,)

    act_bytes = jnp.dtype(compute_dtype).itemsize
    flops = 2 * pad_b * (S * HIDDEN + HIDDEN * HIDDEN + HIDDEN * A)
    bytes_accessed = (
        pad_b * S * act_bytes                                   # x
        + (S * HIDDEN + HIDDEN * HIDDEN + HIDDEN * A) * act_bytes  # weights
        + (HIDDEN + HIDDEN + A) * 4                             # biases (f32)
        + pad_b * A * 4                                         # output (f32)
    )

    out = pl.pallas_call(
        _mlp_kernel,
        out_shape=jax.ShapeDtypeStruct((pad_b, A), jnp.float32),
        grid=grid,
        in_specs=[
            pl.BlockSpec((tm, S), lambda i: (i, 0)),           # x: batch-tiled
            pl.BlockSpec((S, HIDDEN), lambda i: (0, 0)),       # w1: resident
            pl.BlockSpec((1, HIDDEN), lambda i: (0, 0)),       # b1: resident
            pl.BlockSpec((HIDDEN, HIDDEN), lambda i: (0, 0)),  # w2: resident
            pl.BlockSpec((1, HIDDEN), lambda i: (0, 0)),       # b2: resident
            pl.BlockSpec((HIDDEN, A), lambda i: (0, 0)),       # w3: resident
            pl.BlockSpec((1, A), lambda i: (0, 0)),            # b3: resident
        ],
        # Narrow (tm, A) output block: last dim equals the full array dim, so
        # this is legal; writeback bytes drop ~32x vs the old 128-lane pad.
        out_specs=pl.BlockSpec((tm, A), lambda i: (i, 0)),
        compiler_params=pltpu.CompilerParams(
            dimension_semantics=("parallel",),   # shards batch across v7x's 2 TCs
        ),
        cost_estimate=pl.CostEstimate(
            flops=flops, transcendentals=0, bytes_accessed=bytes_accessed),
    )(x, params["w1"], params["b1"], params["w2"], params["b2"],
      params["w3"], params["b3"])

    return out[:B]


def init_params(key, state_size, action_size):
    """Deterministic init mimicking PyTorch nn.Linear default
    (uniform in +-1/sqrt(fan_in)); weights stored [in, out] so the kernel
    does x @ W + b (== PyTorch x @ W.T + b)."""
    def linear(k, fan_in, fan_out):
        kw, kb = jax.random.split(k)
        bound = 1.0 / jnp.sqrt(float(fan_in))
        w = jax.random.uniform(kw, (fan_in, fan_out), jnp.float32, -bound, bound)
        b = jax.random.uniform(kb, (1, fan_out), jnp.float32, -bound, bound)
        return w, b

    k1, k2, k3 = jax.random.split(key, 3)
    w1, b1 = linear(k1, state_size, HIDDEN)
    w2, b2 = linear(k2, HIDDEN, HIDDEN)
    w3, b3 = linear(k3, HIDDEN, action_size)
    return {"w1": w1, "b1": b1, "w2": w2, "b2": b2, "w3": w3, "b3": b3}


def prepare_params(params, dtype=jnp.float32):
    """Cast weight matrices to the compute dtype (bf16 halves activation DMA
    on v6e/v7x); biases stay f32, accumulation in the kernel is always f32."""
    return {"w1": params["w1"].astype(dtype), "b1": params["b1"],
            "w2": params["w2"].astype(dtype), "b2": params["b2"],
            "w3": params["w3"].astype(dtype), "b3": params["b3"]}


def reference_forward(x, p):
    h1 = jnp.maximum(x @ p["w1"] + p["b1"], 0.0)
    h2 = jnp.maximum(h1 @ p["w2"] + p["b2"], 0.0)
    return h2 @ p["w3"] + p["b3"]


if __name__ == "__main__":
    # LunarLander-v2: state_size=8, action_size=4.
    state_size, action_size = 8, 4

    key = jax.random.PRNGKey(0)
    k_params, k_x = jax.random.split(key)
    params = init_params(k_params, state_size, action_size)

    # Small inference-style batch (single grid step).
    x = jax.random.normal(k_x, (8, state_size), jnp.float32)
    out = jax.block_until_ready(network_forward(x, params))
    ref = reference_forward(x, params)
    assert out.shape == (8, action_size)
    assert jnp.allclose(out, ref, atol=1e-5, rtol=1e-5)

    # Non-aligned replay batch: 300 rows -> one 304-row tile (no 512 blow-up).
    xb = jax.random.normal(jax.random.PRNGKey(1), (300, state_size), jnp.float32)
    outb = jax.block_until_ready(network_forward(xb, params))
    refb = reference_forward(xb, params)
    assert outb.shape == (300, action_size)
    assert jnp.allclose(outb, refb, atol=1e-5, rtol=1e-5)

    # Large replay batch: 1500 rows -> 4 tiles of 384 (even grid for v7x).
    xc = jax.random.normal(jax.random.PRNGKey(2), (1500, state_size), jnp.float32)
    outc = jax.block_until_ready(network_forward(xc, params))
    refc = reference_forward(xc, params)
    assert outc.shape == (1500, action_size)
    assert jnp.allclose(outc, refc, atol=1e-5, rtol=1e-5)

    # bf16 activation/weight path (f32 accumulation): halves x DMA on v6e/v7x.
    params_bf16 = prepare_params(params, jnp.bfloat16)
    outd = jax.block_until_ready(network_forward(xc, params_bf16))
    assert outd.shape == (1500, action_size)
    assert jnp.allclose(outd, refc, atol=5e-2, rtol=5e-2)

    print("KERNEL_OK")
</pallas_src>

<mosaic_0001>
module attributes {stable_mosaic.version = 11 : i64} {
  func.func @_mlp_kernel(%arg0: i32, %arg1: memref<16x8xf32, #tpu.memory_space<vmem>>, %arg2: memref<8x64xf32, #tpu.memory_space<vmem>>, %arg3: memref<1x64xf32, #tpu.memory_space<vmem>>, %arg4: memref<64x64xf32, #tpu.memory_space<vmem>>, %arg5: memref<1x64xf32, #tpu.memory_space<vmem>>, %arg6: memref<64x4xf32, #tpu.memory_space<vmem>>, %arg7: memref<1x4xf32, #tpu.memory_space<vmem>>, %arg8: memref<16x4xf32, #tpu.memory_space<vmem>>) attributes {dimension_semantics = [#tpu.dimension_semantics<parallel>], iteration_bounds = array<i64: 1>, scalar_prefetch = 0 : i64, scratch_operands = 0 : i64, tpu.core_type = #tpu.core_type<tc>, window_params = [{transform_indices = @transform_0, window_bounds = array<i64: 16, 8>}, {pipeline_mode = #tpu.pipeline_mode<synchronous>, transform_indices = @transform_1, window_bounds = array<i64: 8, 64>}, {pipeline_mode = #tpu.pipeline_mode<synchronous>, transform_indices = @transform_2, window_bounds = array<i64: 1, 64>}, {pipeline_mode = #tpu.pipeline_mode<synchronous>, transform_indices = @transform_3, window_bounds = array<i64: 64, 64>}, {pipeline_mode = #tpu.pipeline_mode<synchronous>, transform_indices = @transform_4, window_bounds = array<i64: 1, 64>}, {pipeline_mode = #tpu.pipeline_mode<synchronous>, transform_indices = @transform_5, window_bounds = array<i64: 64, 4>}, {pipeline_mode = #tpu.pipeline_mode<synchronous>, transform_indices = @transform_6, window_bounds = array<i64: 1, 4>}, {transform_indices = @transform_7, window_bounds = array<i64: 16, 4>}]} {
    %c0 = arith.constant 0 : index
    %c0_0 = arith.constant 0 : index
    %0 = vector.load %arg1[%c0, %c0_0] : memref<16x8xf32, #tpu.memory_space<vmem>>, vector<16x8xf32>
    %c0_1 = arith.constant 0 : index
    %c0_2 = arith.constant 0 : index
    %1 = vector.load %arg2[%c0_1, %c0_2] : memref<8x64xf32, #tpu.memory_space<vmem>>, vector<8x64xf32>
    %cst = arith.constant dense<0.000000e+00> : vector<16x64xf32>
    %2 = tpu.matmul %0, %1, %cst {dimension_numbers = #tpu.dot_dimension_numbers<[1], [0], [0], [1], [0, 0, 1, 1], [], []>} : vector<16x8xf32>, vector<8x64xf32>, vector<16x64xf32> -> vector<16x64xf32>
    %c0_3 = arith.constant 0 : index
    %c0_4 = arith.constant 0 : index
    %3 = vector.load %arg3[%c0_3, %c0_4] : memref<1x64xf32, #tpu.memory_space<vmem>>, vector<1x64xf32>
    %4 = vector.broadcast %3 : vector<1x64xf32> to vector<16x64xf32>
    %5 = arith.addf %2, %4 : vector<16x64xf32>
    %cst_5 = arith.constant 0.000000e+00 : f32
    %6 = vector.broadcast %cst_5 : f32 to vector<16x64xf32>
    %7 = arith.maximumf %5, %6 : vector<16x64xf32>
    %c0_6 = arith.constant 0 : index
    %c0_7 = arith.constant 0 : index
    %8 = vector.load %arg4[%c0_6, %c0_7] : memref<64x64xf32, #tpu.memory_space<vmem>>, vector<64x64xf32>
    %cst_8 = arith.constant dense<0.000000e+00> : vector<16x64xf32>
    %9 = tpu.matmul %7, %8, %cst_8 {dimension_numbers = #tpu.dot_dimension_numbers<[1], [0], [0], [1], [0, 0, 1, 1], [], []>} : vector<16x64xf32>, vector<64x64xf32>, vector<16x64xf32> -> vector<16x64xf32>
    %c0_9 = arith.constant 0 : index
    %c0_10 = arith.constant 0 : index
    %10 = vector.load %arg5[%c0_9, %c0_10] : memref<1x64xf32, #tpu.memory_space<vmem>>, vector<1x64xf32>
    %11 = vector.broadcast %10 : vector<1x64xf32> to vector<16x64xf32>
    %12 = arith.addf %9, %11 : vector<16x64xf32>
    %cst_11 = arith.constant 0.000000e+00 : f32
    %13 = vector.broadcast %cst_11 : f32 to vector<16x64xf32>
    %14 = arith.maximumf %12, %13 : vector<16x64xf32>
    %c0_12 = arith.constant 0 : index
    %c0_13 = arith.constant 0 : index
    %15 = vector.load %arg6[%c0_12, %c0_13] : memref<64x4xf32, #tpu.memory_space<vmem>>, vector<64x4xf32>
    %cst_14 = arith.constant dense<0.000000e+00> : vector<16x4xf32>
    %16 = tpu.matmul %14, %15, %cst_14 {dimension_numbers = #tpu.dot_dimension_numbers<[1], [0], [0], [1], [0, 0, 1, 1], [], []>} : vector<16x64xf32>, vector<64x4xf32>, vector<16x4xf32> -> vector<16x4xf32>
    %c0_15 = arith.constant 0 : index
    %c0_16 = arith.constant 0 : index
    %17 = vector.load %arg7[%c0_15, %c0_16] : memref<1x4xf32, #tpu.memory_space<vmem>>, vector<1x4xf32>
    %18 = vector.broadcast %17 : vector<1x4xf32> to vector<16x4xf32>
    %19 = arith.addf %16, %18 : vector<16x4xf32>
    %c0_17 = arith.constant 0 : index
    %c0_18 = arith.constant 0 : index
    %20 = vector.load %arg8[%c0_17, %c0_18] : memref<16x4xf32, #tpu.memory_space<vmem>>, vector<16x4xf32>
    tpu.vector_store %arg8[%c0_17, %c0_18], %19 {strides = array<i32>} : memref<16x4xf32, #tpu.memory_space<vmem>>, vector<16x4xf32>,
    return
  }
  func.func @transform_0(%arg0: i32) -> (i32, i32) {
    %c0_i32 = arith.constant 0 : i32
    %c0_i32_0 = arith.constant 0 : i32
    return %arg0, %c0_i32 : i32, i32
  }
  func.func @transform_1(%arg0: i32) -> (i32, i32) {
    %c0_i32 = arith.constant 0 : i32
    %c0_i32_0 = arith.constant 0 : i32
    %c0_i32_1 = arith.constant 0 : i32
    return %c0_i32, %c0_i32_0 : i32, i32
  }
  func.func @transform_2(%arg0: i32) -> (i32, i32) {
    %c0_i32 = arith.constant 0 : i32
    %c0_i32_0 = arith.constant 0 : i32
    %c0_i32_1 = arith.constant 0 : i32
    return %c0_i32, %c0_i32_0 : i32, i32
  }
  func.func @transform_3(%arg0: i32) -> (i32, i32) {
    %c0_i32 = arith.constant 0 : i32
    %c0_i32_0 = arith.constant 0 : i32
    %c0_i32_1 = arith.constant 0 : i32
    return %c0_i32, %c0_i32_0 : i32, i32
  }
  func.func @transform_4(%arg0: i32) -> (i32, i32) {
    %c0_i32 = arith.constant 0 : i32
    %c0_i32_0 = arith.constant 0 : i32
    %c0_i32_1 = arith.constant 0 : i32
    return %c0_i32, %c0_i32_0 : i32, i32
  }
  func.func @transform_5(%arg0: i32) -> (i32, i32) {
    %c0_i32 = arith.constant 0 : i32
    %c0_i32_0 = arith.constant 0 : i32
    %c0_i32_1 = arith.constant 0 : i32
    return %c0_i32, %c0_i32_0 : i32, i32
  }
  func.func @transform_6(%arg0: i32) -> (i32, i32) {
    %c0_i32 = arith.constant 0 : i32
    %c0_i32_0 = arith.constant 0 : i32
    %c0_i32_1 = arith.constant 0 : i32
    return %c0_i32, %c0_i32_0 : i32, i32
  }
  func.func @transform_7(%arg0: i32) -> (i32, i32) {
    %c0_i32 = arith.constant 0 : i32
    %c0_i32_0 = arith.constant 0 : i32
    return %arg0, %c0_i32 : i32, i32
  }
}

</mosaic_0001>

<bundles_post_ra>
// kernel: tpu_custom_call.1
= control target key start
LH: loop header
LB: loop body
LE: loop exit
PB: predicated region body
PF: predicated region fallthrough
CT: control target
= control target key end

     0   :  { %vm36_vm0 = vcmask 64512   ;;  %vm135_vm1 = vcmask 523264   ;;  %vm315_vm2 = vcmask 31744   ;;  %s545_s1 = inlined_call_operand.vmem [shape: f32[8,64], index: 1, kind: input, shape index: {}]   ;;  %s546_s0 = inlined_call_operand.vmem [shape: f32[16,8], index: 0, kind: input, shape index: {}]   ;;  %s547_s3 = inlined_call_operand.vmem [shape: f32[64,64], index: 3, kind: input, shape index: {}]   ;;  %s548_s5 = inlined_call_operand.vmem [shape: f32[64,4], index: 5, kind: input, shape index: {}]   ;;  %s549_s2 = inlined_call_operand.vmem [shape: f32[1,64], index: 2, kind: input, shape index: {}]   ;;  %s550_s4 = inlined_call_operand.vmem [shape: f32[1,64], index: 4, kind: input, shape index: {}]   ;;  %s551_s6 = inlined_call_operand.vmem [shape: f32[1,4], index: 6, kind: input, shape index: {}]   ;;  %s552_s7 = inlined_call_operand.vmem [shape: f32[16,4], index: 7, kind: output, shape index: {}]  }
   0x1   :  { %v28_v0 = vld [vmem:[%s545_s1] sm:$0xff]  ;;  %v27_v2 = vld [vmem:[%s546_s0 + $0x8] sm:$0xff]  ;;  %v122_v5 = vld [vmem:[%s547_s3 + $0x10] sm:$0xff] }
   0x2   :  { %v26_v1 = vld [vmem:[%s546_s0] sm:$0xff]  ;;  %354 = vmatprep.subr.mxu0 %v28_v0  ;;  %v121_v4 = vld [vmem:[%s547_s3 + $0x8] sm:$0xff]  ;;  %v123_v7 = vld [vmem:[%s547_s3 + $0x18] sm:$0xff] }
   0x3   :  { %356 = vmatprep.mubr.msk.f32.mxu0 %vm36_vm0, %v26_v1  ;;  %v120_v3 = vld [vmem:[%s547_s3] sm:$0xff]  ;;  %355 = vmatpush3.msra.mxu0 %v28_v0  ;;  %v401_v8 = vpack.c.bf16 %v123_v7, %v122_v5  ;;  %v125_v10 = vld [vmem:[%s547_s3 + $0x28] sm:$0xff]  ;;  %v126_v12 = vld [vmem:[%s547_s3 + $0x30] sm:$0xff] }
   0x4   :  { %v397_v6 = vpack.c.bf16 %v121_v4, %v120_v3  ;;  %357 = vmatmul.mubr.msk.f32.vlgmr.msra.gmra.mrb[0].mxu0 %vm36_vm0, %v27_v2  ;;  %v124_v9 = vld [vmem:[%s547_s3 + $0x20] sm:$0xff]  ;;  %v127_v13 = vld [vmem:[%s547_s3 + $0x38] sm:$0xff]  ;;  %v220_v16 = vld [vmem:[%s548_s5 + $0x8] sm:$0xff] }
   0x5   :  { %v405_v11 = vpack.c.bf16 %v125_v10, %v124_v9  ;;  %v409_v14 = vpack.c.bf16 %v127_v13, %v126_v12  ;;  %v219_v15 = vld [vmem:[%s548_s5] sm:$0xff]  ;;  %v221_v17 = vld [vmem:[%s548_s5 + $0x10] sm:$0xff]  ;;  %v222_v19 = vld [vmem:[%s548_s5 + $0x18] sm:$0xff] }
   0x6   :  { %398 = vmatprep.subr.bf16.mxu1 %v397_v6  ;;  %v413_v18 = vpack.c.bf16 %v220_v16, %v219_v15  ;;  %v417_v20 = vpack.c.bf16 %v222_v19, %v221_v17  ;;  %v223_v21 = vld [vmem:[%s548_s5 + $0x20] sm:$0xff]  ;;  %v224_v22 = vld [vmem:[%s548_s5 + $0x28] sm:$0xff]  ;;  %v225_v31 = vld [vmem:[%s548_s5 + $0x30] sm:$0xff] }
   0x7   :  { %400 = vmatpush3.bf16.msra.mxu1 %v397_v6  ;;  %v421_v23 = vpack.c.bf16 %v224_v22, %v223_v21  ;;  %v322_v24 = vld [vmem:[%s549_s2] ss:$0 sm:$0xff]  ;;  %v226_v32 = vld [vmem:[%s548_s5 + $0x38] sm:$0xff] }
   0x8   :  { %402 = vmatprep.subr.bf16.mxu1 %v401_v8  ;;  %414 = vmatprep.subr.bf16.mxu0 %v413_v18  ;;  %v425_v33 = vpack.c.bf16 %v226_v32, %v225_v31  ;;  %v325_v34 = vld [vmem:[%s550_s4] ss:$0 sm:$0xff] }
   0x9   :  { %416 = vmatpush3.bf16.msra.mxu0 %v413_v18  ;;  %v328_v41 = vld [vmem:[%s551_s6] ss:$0 sm:$0xff] }
   0xa   :  { %418 = vmatprep.subr.bf16.mxu0 %v417_v20 }
   0xb   :  { %404 = vmatpush3.bf16.msra.mxu1 %v401_v8 }
   0xc   :  { %406 = vmatprep.subr.bf16.mxu1 %v405_v11 }
   0xd   :  { %420 = vmatpush3.bf16.msra.mxu0 %v417_v20 }
   0xe   :  { %422 = vmatprep.subr.bf16.mxu0 %v421_v23 }
   0xf   :  { %408 = vmatpush3.bf16.msra.mxu1 %v405_v11 }
  0x10   :  { %410 = vmatprep.subr.bf16.mxu1 %v409_v14 }
  0x11   :  { %424 = vmatpush3.bf16.msra.mxu0 %v421_v23 }
  0x12   :  { %426 = vmatprep.subr.bf16.mxu0 %v425_v33 }
  0x13   :  { %412 = vmatpush3.bf16.msra.mxu1 %v409_v14 }
  0x15   :  { %428 = vmatpush3.bf16.msra.mxu0 %v425_v33 }
  0xd7   :  { %v358_v25 = vpop.f32.mrb[0].mxu0 }
  0xd8   :  { %v115_v26 = vadd.f32 %v358_v25, %v322_v24  ;;  %v109_v27 = vpop.f32.mrb[1].mxu0 }
  0xd9   :  { %v110_v28 = vadd.f32 %v322_v24, %v109_v27 }
  0xda   :  { %v119_v30 = vmax.f32 %v115_v26, 0.0 }
  0xdb   :  { %v118_v29 = vmax.f32 %v110_v28, 0.0 }
  0xdd   :  { %375 = vmatprep.mubr.msk.f32.mxu1 %vm135_vm1, %v118_v29 }
  0xde   :  { %376 = vmatmul.mubr.msk.f32.vlgmr.msra.gmra.mrb[0].mxu1 %vm135_vm1, %v119_v30 }
 0x1b1   :  { %v377_v35 = vpop.f32.mrb[0].mxu1 }
 0x1b2   :  { %v214_v36 = vadd.f32 %v377_v35, %v325_v34  ;;  %v208_v37 = vpop.f32.mrb[1].mxu1 }
 0x1b3   :  { %v209_v38 = vadd.f32 %v325_v34, %v208_v37 }
 0x1b4   :  { %v218_v40 = vmax.f32 %v214_v36, 0.0 }
 0x1b5   :  { %v217_v39 = vmax.f32 %v209_v38, 0.0 }
 0x1b7   :  { %394 = vmatprep.mubr.msk.f32.mxu0 %vm135_vm1, %v217_v39 }
 0x1b8   :  { %395 = vmatmul.mubr.msk.f32.vlgmr.msra.gmra.mrb[2].mxu0 %vm135_vm1, %v218_v40 }
 0x28b   :  { %v396_v42 = vpop.f32.mrb[2].mxu0 }
 0x28c   :  { %v312_v43 = vadd.f32 %v396_v42, %v328_v41  ;;  %v306_v44 = vpop.f32.mrb[3].mxu0 }
 0x28d   :  { %v307_v45 = vadd.f32 %v328_v41, %v306_v44 }
 0x28e   :  { %317 = vst.msk [vmem:[%s552_s7 + $0x8] sm:$0xff] %vm315_vm2, %v312_v43 }
 0x28f   :  { %316 = vst.msk [vmem:[%s552_s7] sm:$0xff] %vm315_vm2, %v307_v45 }

</bundles_post_ra>
